<compile_context>
chip_gen: v7x
topology: tpu7x:2x2x1
jax: 0.10.0
libtpu: 0.0.40
codegen_flags: <defaults>
</compile_context>

<pallas_src>
import functools

import jax
import jax.numpy as jnp
import numpy as np
from jax.experimental import pallas as pl
from jax.experimental.pallas import tpu as pltpu


# --------------------------------- helpers ----------------------------------

def _pick_tile(dim, candidates):
    """Largest candidate evenly dividing `dim`, else the full extent (legal:
    a block equal to the full array dim always satisfies the (8,128) rule)."""
    for c in candidates:
        if c <= dim and dim % c == 0:
            return c
    return dim


@functools.lru_cache(maxsize=None)
def _vmem_limit_bytes():
    """~3/4 of physical VMEM (capped); None if the query is unavailable."""
    try:
        info = pltpu.get_tpu_info()
        cap = getattr(info, "vmem_capacity_bytes", None)
        if not cap:
            return None
        return int(min(cap * 3 // 4, 96 * 1024 * 1024))
    except Exception:
        return None


def _compiler_params(dimension_semantics):
    kwargs = dict(dimension_semantics=dimension_semantics)
    limit = _vmem_limit_bytes()
    if limit is not None:
        kwargs["vmem_limit_bytes"] = limit
    return pltpu.CompilerParams(**kwargs)


# ----------------------------- Pallas kernels -------------------------------

def make_char_conv_kernel(Lout):
    """Conv1d(k=2, pad=1) + max-over-time + ReLU for a chunk of words.

    x_ref: (Lout, tn, 2C) time-major; x_ref[t, n] = [x_pad[n,t,:], x_pad[n,t+1,:]]
    w_ref: (2C, Hc) stacked tap weights (f32 or bf16)
    b_ref: (1, Hc)  f32
    o_ref: (tn, Hc) f32
    """
    def kernel(x_ref, w_ref, b_ref, o_ref):
        w = w_ref[...]
        mx = jnp.dot(x_ref[0], w, preferred_element_type=jnp.float32)
        for t in range(1, Lout):                 # static unroll over taps/time
            mx = jnp.maximum(
                mx, jnp.dot(x_ref[t], w, preferred_element_type=jnp.float32))
        # bias is time-invariant and ReLU is monotone -> apply after the max
        o_ref[...] = jnp.maximum(mx + b_ref[...], 0.0)
    return kernel


def char_conv(x2, w2, b):
    Lout, N, C2 = x2.shape
    Hc = w2.shape[-1]
    tn = _pick_tile(N, (512, 256, 128, 64, 32, 16, 8))
    return pl.pallas_call(
        make_char_conv_kernel(Lout),
        out_shape=jax.ShapeDtypeStruct((N, Hc), jnp.float32),
        grid=(N // tn,),
        in_specs=[pl.BlockSpec((Lout, tn, C2), lambda i: (0, i, 0)),
                  pl.BlockSpec((C2, Hc), lambda i: (0, 0)),
                  pl.BlockSpec((1, Hc), lambda i: (0, 0))],
        out_specs=pl.BlockSpec((tn, Hc), lambda i: (i, 0)),
        compiler_params=_compiler_params(("parallel",)),
    )(x2, w2, b)


def matmul_bias_kernel(x_ref, w_ref, b_ref, o_ref, acc_ref):
    @pl.when(pl.program_id(2) == 0)
    def _():
        acc_ref[...] = jnp.zeros_like(acc_ref)
    acc_ref[...] += jnp.dot(x_ref[...], w_ref[...],
                            preferred_element_type=jnp.float32)
    @pl.when(pl.program_id(2) == pl.num_programs(2) - 1)
    def _():
        o_ref[...] = acc_ref[...] + b_ref[...]


def matmul_bias(x, w, b):
    """Tiled (M,K)@(K,N)+bias with f32 accumulation (operands may be bf16)."""
    M, K = x.shape
    _, N = w.shape
    tm = _pick_tile(M, (512, 256, 128, 64, 32, 16, 8))
    tn = _pick_tile(N, (512, 256, 128))
    tk = _pick_tile(K, (512, 256, 128))
    return pl.pallas_call(
        matmul_bias_kernel,
        out_shape=jax.ShapeDtypeStruct((M, N), jnp.float32),
        grid=(M // tm, N // tn, K // tk),
        in_specs=[pl.BlockSpec((tm, tk), lambda i, j, k: (i, k)),
                  pl.BlockSpec((tk, tn), lambda i, j, k: (k, j)),
                  pl.BlockSpec((1, tn), lambda i, j, k: (0, j))],
        out_specs=pl.BlockSpec((tm, tn), lambda i, j, k: (i, j)),
        scratch_shapes=[pltpu.VMEM((tm, tn), jnp.float32)],
        compiler_params=_compiler_params(("parallel", "parallel", "arbitrary")),
    )(x, w, b)


def make_bilstm_kernel(H, fuse_hh, compute_dtype):
    """One step of the fused bidirectional LSTM recurrence (grid=(S,)).

    lens_ref: (B, 1) int32 sequence lengths (resident)
    xpf_ref : (1, B, 4H) fwd pre-projected gates at t = s
    xpb_ref : (1, B, 4H) bwd pre-projected gates at t = S-1-s
    whh_ref : fused  -> (2H, 8H) block-diagonal [[Whh_f^T, 0], [0, Whh_b^T]]
              split  -> (2, H, 4H) stacked [Whh_f^T, Whh_b^T]
    of_ref  : (1, B, H) forward output at t = s      (zero past seq_len)
    ob_ref  : (1, B, H) backward output at t = S-1-s (zero past seq_len)
    scratch : h_scr (B, 2H) = [h_f | h_b], cf_scr (B, H), cb_scr (B, H)
    """
    G = 4 * H

    def cell(g, c_prev):
        # PyTorch gate order: i, f, g, o ; all gate math kept in f32 (EUP-bound)
        i = jax.nn.sigmoid(g[:, 0:H])
        f = jax.nn.sigmoid(g[:, H:2 * H])
        gg = jnp.tanh(g[:, 2 * H:3 * H])
        o = jax.nn.sigmoid(g[:, 3 * H:4 * H])
        c_new = f * c_prev + i * gg
        h_new = o * jnp.tanh(c_new)
        return h_new, c_new

    def kernel(lens_ref, xpf_ref, xpb_ref, whh_ref, of_ref, ob_ref,
               h_scr, cf_scr, cb_scr):
        s = pl.program_id(0)
        S = pl.num_programs(0)

        @pl.when(s == 0)
        def _():
            h_scr[...] = jnp.zeros_like(h_scr)
            cf_scr[...] = jnp.zeros_like(cf_scr)
            cb_scr[...] = jnp.zeros_like(cb_scr)

        t_f = s
        t_b = S - 1 - s
        lens = lens_ref[...]                         # (B, 1) int32, resident
        h_cat = h_scr[...]                           # (B, 2H) f32

        if fuse_hh:
            g_rec = jnp.dot(h_cat.astype(compute_dtype), whh_ref[...],
                            preferred_element_type=jnp.float32)
            rec_f = g_rec[:, :G]
            rec_b = g_rec[:, G:]
        else:
            rec_f = jnp.dot(h_cat[:, :H].astype(compute_dtype), whh_ref[0],
                            preferred_element_type=jnp.float32)
            rec_b = jnp.dot(h_cat[:, H:].astype(compute_dtype), whh_ref[1],
                            preferred_element_type=jnp.float32)

        gf = xpf_ref[0] + rec_f                      # (B, 4H) f32
        gb = xpb_ref[0] + rec_b

        cf = cf_scr[...]
        cb = cb_scr[...]
        hf_new, cf_new = cell(gf, cf)
        hb_new, cb_new = cell(gb, cb)

        # pack_padded_sequence semantics: freeze state / zero output at t>=len
        m_f = t_f < lens                             # (B, 1) bool
        m_b = t_b < lens
        zero = jnp.zeros_like(hf_new)
        h_scr[:, :H] = jnp.where(m_f, hf_new, h_cat[:, :H])
        h_scr[:, H:] = jnp.where(m_b, hb_new, h_cat[:, H:])
        cf_scr[...] = jnp.where(m_f, cf_new, cf)
        cb_scr[...] = jnp.where(m_b, cb_new, cb)
        of_ref[0] = jnp.where(m_f, hf_new, zero)
        ob_ref[0] = jnp.where(m_b, hb_new, zero)

    return kernel


def bilstm(lens2, xproj, whh, fuse_hh, compute_dtype):
    S, B, G8 = xproj.shape
    H = G8 // 8
    G = 4 * H
    if fuse_hh:
        whh_spec = pl.BlockSpec((2 * H, 2 * G), lambda s: (0, 0))
    else:
        whh_spec = pl.BlockSpec((2, H, G), lambda s: (0, 0, 0))
    return pl.pallas_call(
        make_bilstm_kernel(H, fuse_hh, compute_dtype),
        out_shape=(jax.ShapeDtypeStruct((S, B, H), jnp.float32),
                   jax.ShapeDtypeStruct((S, B, H), jnp.float32)),
        grid=(S,),
        in_specs=[pl.BlockSpec((B, 1), lambda s: (0, 0)),             # lens
                  pl.BlockSpec((1, B, G), lambda s: (s, 0, 0)),       # fwd gates
                  pl.BlockSpec((1, B, G), lambda s: (S - 1 - s, 0, 1)),  # bwd gates
                  whh_spec],                                          # resident W_hh
        out_specs=(pl.BlockSpec((1, B, H), lambda s: (s, 0, 0)),
                   pl.BlockSpec((1, B, H), lambda s: (S - 1 - s, 0, 0))),
        scratch_shapes=[pltpu.VMEM((B, 2 * H), jnp.float32),   # [h_f | h_b]
                        pltpu.VMEM((B, H), jnp.float32),       # c_f
                        pltpu.VMEM((B, H), jnp.float32)],      # c_b
        compiler_params=_compiler_params(("arbitrary",)),
    )(lens2, xproj, xproj, whh)


# --------------------------- weight prep + forward ---------------------------

def prepare_weights(params, weights, use_bf16=True):
    """Precompute fused/reshaped weights ONCE (not inside the per-call path)."""
    H = params["hidden_dimension"]
    cdt = jnp.bfloat16 if use_bf16 else jnp.float32
    pw = dict(compute_dtype=cdt, word_emb=weights["word_emb"], lstm=[])
    if params["use_char_embedding"] == 1:
        C = weights["char_emb"].shape[-1]
        pw["char_emb"] = weights["char_emb"]
        pw["conv_w"] = weights["conv_w"].reshape(2 * C, -1).astype(cdt)  # (2C,Hc)
        pw["conv_b"] = weights["conv_b"].astype(jnp.float32)
    # Fuse both directions into one block-diagonal hidden-to-hidden matmul only
    # while 4H is too narrow to fill a 256-wide MXU on its own.
    fuse_hh = (4 * H) < 256
    for layer in weights["lstm"]:
        wih_cat = jnp.concatenate([layer["fwd"]["wih"], layer["bwd"]["wih"]],
                                  axis=1).astype(cdt)                    # (Din,8H)
        b_cat = jnp.concatenate([layer["fwd"]["b"], layer["bwd"]["b"]],
                                axis=1).astype(jnp.float32)              # (1,8H)
        if fuse_hh:
            whh = jnp.zeros((2 * H, 8 * H), jnp.float32)
            whh = whh.at[:H, :4 * H].set(layer["fwd"]["whh"])
            whh = whh.at[H:, 4 * H:].set(layer["bwd"]["whh"])
        else:
            whh = jnp.stack([layer["fwd"]["whh"], layer["bwd"]["whh"]], axis=0)
        pw["lstm"].append(dict(wih_cat=wih_cat, b_cat=b_cat,
                               whh=whh.astype(cdt), fuse_hh=fuse_hh))
    return pw


def encoder_forward(params, pw, seq, seq_lens, chars):
    B, S = seq.shape
    H = params["hidden_dimension"]
    cdt = pw["compute_dtype"]

    embeds = jnp.take(pw["word_emb"], seq.T, axis=0)                  # (S,B,E)
    if params["use_char_embedding"] == 1:
        Bc, Sc, Lc = chars.shape
        N = Bc * Sc
        ch = jnp.take(pw["char_emb"], chars.reshape(N, Lc), axis=0)   # (N,Lc,C)
        ch = jnp.pad(ch.transpose(1, 0, 2), ((1, 1), (0, 0), (0, 0))) # (Lc+2,N,C)
        # concat the two conv taps along features, time-major: (Lout, N, 2C)
        x2 = jnp.concatenate([ch[:-1], ch[1:]], axis=-1).astype(cdt)
        feat = char_conv(x2, pw["conv_w"], pw["conv_b"])              # (N,Hc) f32
        # TODO(synk): at production pad Hc to 128 lanes (or write straight into
        #             the embedding slab) to avoid narrow-lane stores here.
        feat = feat.reshape(Bc, Sc, -1).transpose(1, 0, 2)            # (S,B,Hc)
        embeds = jnp.concatenate([embeds, feat], axis=2)

    # TODO(synk): nn.Dropout treated as identity (inference mode).

    lens2 = seq_lens.reshape(B, 1).astype(jnp.int32)
    x = embeds
    for layer in pw["lstm"]:
        Din = x.shape[-1]
        # hoisted input-to-hidden projection for both directions (one tiled
        # matmul); output kept f32 so the gate math stays f32.
        xproj = matmul_bias(x.reshape(S * B, Din).astype(cdt),
                            layer["wih_cat"], layer["b_cat"])         # (S*B,8H)
        xproj = xproj.reshape(S, B, 8 * H)
        out_f, out_b = bilstm(lens2, xproj, layer["whh"],
                              layer["fuse_hh"], cdt)
        # TODO(synk): for n_layers > 1 feed out_f/out_b through split wih halves
        #             to avoid this concat HBM pass between layers.
        x = jnp.concatenate([out_f, out_b], axis=-1)                  # (S,B,2H)
    return x.transpose(1, 0, 2)                                       # (B,S,2H)


# ------------------------------ pure-JAX reference ---------------------------

def ref_lstm_dir(x, lens, wih_t, whh_t, b, reverse):
    S, B, _ = x.shape
    H = whh_t.shape[0]
    h = jnp.zeros((B, H), jnp.float32)
    c = jnp.zeros((B, H), jnp.float32)
    outs = [None] * S
    order = range(S - 1, -1, -1) if reverse else range(S)
    for t in order:
        gates = x[t] @ wih_t + h @ whh_t + b
        i = jax.nn.sigmoid(gates[:, :H]); f = jax.nn.sigmoid(gates[:, H:2 * H])
        g = jnp.tanh(gates[:, 2 * H:3 * H]); o = jax.nn.sigmoid(gates[:, 3 * H:])
        c_new = f * c + i * g
        h_new = o * jnp.tanh(c_new)
        m = (t < lens).astype(jnp.float32)[:, None]
        h = m * h_new + (1 - m) * h
        c = m * c_new + (1 - m) * c
        outs[t] = m * h_new
    return jnp.stack(outs, axis=0)


def ref_encoder(params, weights, seq, seq_lens, chars):
    B, S = seq.shape
    embeds = jnp.take(weights["word_emb"], seq.T, axis=0)
    if params["use_char_embedding"] == 1:
        Bc, Sc, Lc = chars.shape
        ch = jnp.take(weights["char_emb"], chars.reshape(-1, Lc), axis=0)
        xp = jnp.pad(ch, ((0, 0), (1, 1), (0, 0)))
        ys = [xp[:, t, :] @ weights["conv_w"][0]
              + xp[:, t + 1, :] @ weights["conv_w"][1]
              + weights["conv_b"] for t in range(xp.shape[1] - 1)]
        feat = jnp.maximum(jnp.max(jnp.stack(ys, 0), axis=0), 0.0)
        feat = feat.reshape(Bc, Sc, -1).transpose(1, 0, 2)
        embeds = jnp.concatenate([embeds, feat], axis=2)
    x = embeds
    for layer in weights["lstm"]:
        out_f = ref_lstm_dir(x, seq_lens, layer["fwd"]["wih"],
                             layer["fwd"]["whh"], layer["fwd"]["b"], False)
        out_b = ref_lstm_dir(x, seq_lens, layer["bwd"]["wih"],
                             layer["bwd"]["whh"], layer["bwd"]["b"], True)
        x = jnp.concatenate([out_f, out_b], axis=-1)
    return x.transpose(1, 0, 2)


# ------------------------------------ main -----------------------------------

if __name__ == "__main__":
    params = dict(
        vocab_size=50, embedding_dimension=32,
        char_vocab_size=30, embedding_dimension_char=16,
        hidden_dimension_char=16, hidden_dimension=32,
        n_layers=1, dropout=0.0, use_char_embedding=1,
    )
    B, S, Lc = 2, 8, 6
    E = params["embedding_dimension"]
    Ec = params["embedding_dimension_char"]
    Hc = params["hidden_dimension_char"]
    H = params["hidden_dimension"]

    key = jax.random.PRNGKey(0)
    ks = jax.random.split(key, 12)

    def lstm_dir_params(k, din, h):
        k1, k2, k3 = jax.random.split(k, 3)
        return dict(
            wih=jax.random.normal(k1, (din, 4 * h), jnp.float32) * 0.1,  # W_ih^T
            whh=jax.random.normal(k2, (h, 4 * h), jnp.float32) * 0.1,    # W_hh^T
            b=jax.random.normal(k3, (1, 4 * h), jnp.float32) * 0.1,      # b_ih+b_hh
        )

    din0 = E + Hc if params["use_char_embedding"] == 1 else E
    lstm_layers = []
    d_in = din0
    for l in range(params["n_layers"]):
        kf, kb = jax.random.split(ks[4 + l], 2)
        lstm_layers.append(dict(fwd=lstm_dir_params(kf, d_in, H),
                                bwd=lstm_dir_params(kb, d_in, H)))
        d_in = 2 * H

    weights = dict(
        word_emb=jax.random.normal(ks[0], (params["vocab_size"], E), jnp.float32) * 0.1,
        char_emb=jax.random.normal(ks[1], (params["char_vocab_size"], Ec), jnp.float32) * 0.1,
        conv_w=jax.random.normal(ks[2], (2, Ec, Hc), jnp.float32) * 0.1,   # (K,Cin,Cout)
        conv_b=jax.random.normal(ks[3], (1, Hc), jnp.float32) * 0.1,
        lstm=lstm_layers,
    )

    seq = jax.random.randint(ks[8], (B, S), 0, params["vocab_size"], jnp.int32)
    chars = jax.random.randint(ks[9], (B, S, Lc), 0, params["char_vocab_size"], jnp.int32)
    seq_lens = jnp.array([8, 6], dtype=jnp.int32)   # sorted desc (pack_padded_sequence)

    # full-f32 reference at highest matmul precision (tight baseline)
    with jax.default_matmul_precision("highest"):
        ref = jax.block_until_ready(
            ref_encoder(params, weights, seq, seq_lens, chars))

    # --- all-f32 Pallas path: tight tolerance check --------------------------
    pw32 = prepare_weights(params, weights, use_bf16=False)
    fwd32 = jax.jit(functools.partial(encoder_forward, params, pw32))
    out32 = jax.block_until_ready(fwd32(seq, seq_lens, chars))
    assert out32.shape == (B, S, 2 * H), out32.shape
    np.testing.assert_allclose(np.asarray(out32), np.asarray(ref),
                               rtol=1e-3, atol=5e-5)

    # --- production path: bf16 MXU operands, f32 accumulate + gate math ------
    pw16 = prepare_weights(params, weights, use_bf16=True)
    fwd16 = jax.jit(functools.partial(encoder_forward, params, pw16))
    out16 = jax.block_until_ready(fwd16(seq, seq_lens, chars))
    assert out16.shape == (B, S, 2 * H), out16.shape
    np.testing.assert_allclose(np.asarray(out16), np.asarray(ref),
                               rtol=2e-2, atol=2e-2)

    print("KERNEL_OK")
</pallas_src>

<mosaic_0001>
module attributes {stable_mosaic.version = 11 : i64} {
  func.func @kernel(%arg0: i32, %arg1: memref<7x16x32xf32, #tpu.memory_space<vmem>>, %arg2: memref<32x16xf32, #tpu.memory_space<vmem>>, %arg3: memref<1x16xf32, #tpu.memory_space<vmem>>, %arg4: memref<16x16xf32, #tpu.memory_space<vmem>>) attributes {dimension_semantics = [#tpu.dimension_semantics<parallel>], iteration_bounds = array<i64: 1>, scalar_prefetch = 0 : i64, scratch_operands = 0 : i64, tpu.core_type = #tpu.core_type<tc>, window_params = [{transform_indices = @transform_0, window_bounds = array<i64: 7, 16, 32>}, {pipeline_mode = #tpu.pipeline_mode<synchronous>, transform_indices = @transform_1, window_bounds = array<i64: 32, 16>}, {pipeline_mode = #tpu.pipeline_mode<synchronous>, transform_indices = @transform_2, window_bounds = array<i64: 1, 16>}, {transform_indices = @transform_3, window_bounds = array<i64: 16, 16>}]} {
    %c0 = arith.constant 0 : index
    %c0_0 = arith.constant 0 : index
    %0 = vector.load %arg2[%c0, %c0_0] : memref<32x16xf32, #tpu.memory_space<vmem>>, vector<32x16xf32>
    %c0_1 = arith.constant 0 : index
    %c0_2 = arith.constant 0 : index
    %c0_3 = arith.constant 0 : index
    %1 = vector.load %arg1[%c0_1, %c0_2, %c0_3] : memref<7x16x32xf32, #tpu.memory_space<vmem>>, vector<1x16x32xf32>
    %2 = vector.shape_cast %1 : vector<1x16x32xf32> to vector<16x32xf32>
    %cst = arith.constant dense<0.000000e+00> : vector<16x16xf32>
    %3 = tpu.matmul %2, %0, %cst {dimension_numbers = #tpu.dot_dimension_numbers<[1], [0], [0], [1], [0, 0, 1, 1], [], []>} : vector<16x32xf32>, vector<32x16xf32>, vector<16x16xf32> -> vector<16x16xf32>
    %c1 = arith.constant 1 : index
    %c0_4 = arith.constant 0 : index
    %c0_5 = arith.constant 0 : index
    %4 = vector.load %arg1[%c1, %c0_4, %c0_5] : memref<7x16x32xf32, #tpu.memory_space<vmem>>, vector<1x16x32xf32>
    %5 = vector.shape_cast %4 : vector<1x16x32xf32> to vector<16x32xf32>
    %cst_6 = arith.constant dense<0.000000e+00> : vector<16x16xf32>
    %6 = tpu.matmul %5, %0, %cst_6 {dimension_numbers = #tpu.dot_dimension_numbers<[1], [0], [0], [1], [0, 0, 1, 1], [], []>} : vector<16x32xf32>, vector<32x16xf32>, vector<16x16xf32> -> vector<16x16xf32>
    %7 = arith.maximumf %3, %6 : vector<16x16xf32>
    %c2 = arith.constant 2 : index
    %c0_7 = arith.constant 0 : index
    %c0_8 = arith.constant 0 : index
    %8 = vector.load %arg1[%c2, %c0_7, %c0_8] : memref<7x16x32xf32, #tpu.memory_space<vmem>>, vector<1x16x32xf32>
    %9 = vector.shape_cast %8 : vector<1x16x32xf32> to vector<16x32xf32>
    %cst_9 = arith.constant dense<0.000000e+00> : vector<16x16xf32>
    %10 = tpu.matmul %9, %0, %cst_9 {dimension_numbers = #tpu.dot_dimension_numbers<[1], [0], [0], [1], [0, 0, 1, 1], [], []>} : vector<16x32xf32>, vector<32x16xf32>, vector<16x16xf32> -> vector<16x16xf32>
    %11 = arith.maximumf %7, %10 : vector<16x16xf32>
    %c3 = arith.constant 3 : index
    %c0_10 = arith.constant 0 : index
    %c0_11 = arith.constant 0 : index
    %12 = vector.load %arg1[%c3, %c0_10, %c0_11] : memref<7x16x32xf32, #tpu.memory_space<vmem>>, vector<1x16x32xf32>
    %13 = vector.shape_cast %12 : vector<1x16x32xf32> to vector<16x32xf32>
    %cst_12 = arith.constant dense<0.000000e+00> : vector<16x16xf32>
    %14 = tpu.matmul %13, %0, %cst_12 {dimension_numbers = #tpu.dot_dimension_numbers<[1], [0], [0], [1], [0, 0, 1, 1], [], []>} : vector<16x32xf32>, vector<32x16xf32>, vector<16x16xf32> -> vector<16x16xf32>
    %15 = arith.maximumf %11, %14 : vector<16x16xf32>
    %c4 = arith.constant 4 : index
    %c0_13 = arith.constant 0 : index
    %c0_14 = arith.constant 0 : index
    %16 = vector.load %arg1[%c4, %c0_13, %c0_14] : memref<7x16x32xf32, #tpu.memory_space<vmem>>, vector<1x16x32xf32>
    %17 = vector.shape_cast %16 : vector<1x16x32xf32> to vector<16x32xf32>
    %cst_15 = arith.constant dense<0.000000e+00> : vector<16x16xf32>
    %18 = tpu.matmul %17, %0, %cst_15 {dimension_numbers = #tpu.dot_dimension_numbers<[1], [0], [0], [1], [0, 0, 1, 1], [], []>} : vector<16x32xf32>, vector<32x16xf32>, vector<16x16xf32> -> vector<16x16xf32>
    %19 = arith.maximumf %15, %18 : vector<16x16xf32>
    %c5 = arith.constant 5 : index
    %c0_16 = arith.constant 0 : index
    %c0_17 = arith.constant 0 : index
    %20 = vector.load %arg1[%c5, %c0_16, %c0_17] : memref<7x16x32xf32, #tpu.memory_space<vmem>>, vector<1x16x32xf32>
    %21 = vector.shape_cast %20 : vector<1x16x32xf32> to vector<16x32xf32>
    %cst_18 = arith.constant dense<0.000000e+00> : vector<16x16xf32>
    %22 = tpu.matmul %21, %0, %cst_18 {dimension_numbers = #tpu.dot_dimension_numbers<[1], [0], [0], [1], [0, 0, 1, 1], [], []>} : vector<16x32xf32>, vector<32x16xf32>, vector<16x16xf32> -> vector<16x16xf32>
    %23 = arith.maximumf %19, %22 : vector<16x16xf32>
    %c6 = arith.constant 6 : index
    %c0_19 = arith.constant 0 : index
    %c0_20 = arith.constant 0 : index
    %24 = vector.load %arg1[%c6, %c0_19, %c0_20] : memref<7x16x32xf32, #tpu.memory_space<vmem>>, vector<1x16x32xf32>
    %25 = vector.shape_cast %24 : vector<1x16x32xf32> to vector<16x32xf32>
    %cst_21 = arith.constant dense<0.000000e+00> : vector<16x16xf32>
    %26 = tpu.matmul %25, %0, %cst_21 {dimension_numbers = #tpu.dot_dimension_numbers<[1], [0], [0], [1], [0, 0, 1, 1], [], []>} : vector<16x32xf32>, vector<32x16xf32>, vector<16x16xf32> -> vector<16x16xf32>
    %27 = arith.maximumf %23, %26 : vector<16x16xf32>
    %c0_22 = arith.constant 0 : index
    %c0_23 = arith.constant 0 : index
    %28 = vector.load %arg3[%c0_22, %c0_23] : memref<1x16xf32, #tpu.memory_space<vmem>>, vector<1x16xf32>
    %29 = vector.broadcast %28 : vector<1x16xf32> to vector<16x16xf32>
    %30 = arith.addf %27, %29 : vector<16x16xf32>
    %cst_24 = arith.constant 0.000000e+00 : f32
    %31 = vector.broadcast %cst_24 : f32 to vector<16x16xf32>
    %32 = arith.maximumf %30, %31 : vector<16x16xf32>
    %c0_25 = arith.constant 0 : index
    %c0_26 = arith.constant 0 : index
    %33 = vector.load %arg4[%c0_25, %c0_26] : memref<16x16xf32, #tpu.memory_space<vmem>>, vector<16x16xf32>
    tpu.vector_store %arg4[%c0_25, %c0_26], %32 {strides = array<i32>} : memref<16x16xf32, #tpu.memory_space<vmem>>, vector<16x16xf32>,
    return
  }
  func.func @transform_0(%arg0: i32) -> (i32, i32, i32) {
    %c0_i32 = arith.constant 0 : i32
    %c0_i32_0 = arith.constant 0 : i32
    %c0_i32_1 = arith.constant 0 : i32
    return %c0_i32, %arg0, %c0_i32_0 : i32, i32, i32
  }
  func.func @transform_1(%arg0: i32) -> (i32, i32) {
    %c0_i32 = arith.constant 0 : i32
    %c0_i32_0 = arith.constant 0 : i32
    %c0_i32_1 = arith.constant 0 : i32
    return %c0_i32, %c0_i32_0 : i32, i32
  }
  func.func @transform_2(%arg0: i32) -> (i32, i32) {
    %c0_i32 = arith.constant 0 : i32
    %c0_i32_0 = arith.constant 0 : i32
    %c0_i32_1 = arith.constant 0 : i32
    return %c0_i32, %c0_i32_0 : i32, i32
  }
  func.func @transform_3(%arg0: i32) -> (i32, i32) {
    %c0_i32 = arith.constant 0 : i32
    %c0_i32_0 = arith.constant 0 : i32
    return %arg0, %c0_i32 : i32, i32
  }
}

module attributes {stable_mosaic.version = 11 : i64} {
  func.func @matmul_bias_kernel(%arg0: i32, %arg1: i32, %arg2: i32, %arg3: memref<16x48xf32, #tpu.memory_space<vmem>>, %arg4: memref<48x256xf32, #tpu.memory_space<vmem>>, %arg5: memref<1x256xf32, #tpu.memory_space<vmem>>, %arg6: memref<16x256xf32, #tpu.memory_space<vmem>>, %arg7: memref<16x256xf32, #tpu.memory_space<vmem>>) attributes {dimension_semantics = [#tpu.dimension_semantics<parallel>, #tpu.dimension_semantics<parallel>, #tpu.dimension_semantics<arbitrary>], iteration_bounds = array<i64: 1, 1, 1>, scalar_prefetch = 0 : i64, scratch_operands = 1 : i64, tpu.core_type = #tpu.core_type<tc>, window_params = [{transform_indices = @transform_0, window_bounds = array<i64: 16, 48>}, {transform_indices = @transform_1, window_bounds = array<i64: 48, 256>}, {transform_indices = @transform_2, window_bounds = array<i64: 1, 256>}, {transform_indices = @transform_3, window_bounds = array<i64: 16, 256>}]} {
    %c0_i32 = arith.constant 0 : i32
    %0 = arith.cmpi eq, %arg2, %c0_i32 : i32
    %1 = arith.extui %0 : i1 to i32
    %c0_i32_0 = arith.constant 0 : i32
    %2 = arith.cmpi ne, %1, %c0_i32_0 : i32
    scf.if %2 {
      %cst_10 = arith.constant 0.000000e+00 : f32
      %12 = vector.broadcast %cst_10 : f32 to vector<16x256xf32>
      %c0_11 = arith.constant 0 : index
      %c0_12 = arith.constant 0 : index
      %13 = vector.load %arg7[%c0_11, %c0_12] : memref<16x256xf32, #tpu.memory_space<vmem>>, vector<16x256xf32>
      tpu.vector_store %arg7[%c0_11, %c0_12], %12 {strides = array<i32>} : memref<16x256xf32, #tpu.memory_space<vmem>>, vector<16x256xf32>,
    } else {
    }
    %c0 = arith.constant 0 : index
    %c0_1 = arith.constant 0 : index
    %3 = vector.load %arg7[%c0, %c0_1] : memref<16x256xf32, #tpu.memory_space<vmem>>, vector<16x256xf32>
    %c0_2 = arith.constant 0 : index
    %c0_3 = arith.constant 0 : index
    %4 = vector.load %arg3[%c0_2, %c0_3] : memref<16x48xf32, #tpu.memory_space<vmem>>, vector<16x48xf32>
    %c0_4 = arith.constant 0 : index
    %c0_5 = arith.constant 0 : index
    %5 = vector.load %arg4[%c0_4, %c0_5] : memref<48x256xf32, #tpu.memory_space<vmem>>, vector<48x256xf32>
    %cst = arith.constant dense<0.000000e+00> : vector<16x256xf32>
    %6 = tpu.matmul %4, %5, %cst {dimension_numbers = #tpu.dot_dimension_numbers<[1], [0], [0], [1], [0, 0, 1, 1], [], []>} : vector<16x48xf32>, vector<48x256xf32>, vector<16x256xf32> -> vector<16x256xf32>
    %7 = arith.addf %3, %6 : vector<16x256xf32>
    %c0_6 = arith.constant 0 : index
    %c0_7 = arith.constant 0 : index
    %8 = vector.load %arg7[%c0_6, %c0_7] : memref<16x256xf32, #tpu.memory_space<vmem>>, vector<16x256xf32>
    tpu.vector_store %arg7[%c0_6, %c0_7], %7 {strides = array<i32>} : memref<16x256xf32, #tpu.memory_space<vmem>>, vector<16x256xf32>,
    %c0_i32_8 = arith.constant 0 : i32
    %9 = arith.cmpi eq, %arg2, %c0_i32_8 : i32
    %10 = arith.extui %9 : i1 to i32
    %c0_i32_9 = arith.constant 0 : i32
    %11 = arith.cmpi ne, %10, %c0_i32_9 : i32
    scf.if %11 {
      %c0_10 = arith.constant 0 : index
      %c0_11 = arith.constant 0 : index
      %12 = vector.load %arg7[%c0_10, %c0_11] : memref<16x256xf32, #tpu.memory_space<vmem>>, vector<16x256xf32>
      %c0_12 = arith.constant 0 : index
      %c0_13 = arith.constant 0 : index
      %13 = vector.load %arg5[%c0_12, %c0_13] : memref<1x256xf32, #tpu.memory_space<vmem>>, vector<1x256xf32>
      %14 = vector.broadcast %13 : vector<1x256xf32> to vector<16x256xf32>
      %15 = arith.addf %12, %14 : vector<16x256xf32>
      %c0_14 = arith.constant 0 : index
      %c0_15 = arith.constant 0 : index
      %16 = vector.load %arg6[%c0_14, %c0_15] : memref<16x256xf32, #tpu.memory_space<vmem>>, vector<16x256xf32>
      tpu.vector_store %arg6[%c0_14, %c0_15], %15 {strides = array<i32>} : memref<16x256xf32, #tpu.memory_space<vmem>>, vector<16x256xf32>,
    } else {
    }
    return
  }
  func.func @transform_0(%arg0: i32, %arg1: i32, %arg2: i32) -> (i32, i32) {
    %c0_i32 = arith.constant 0 : i32
    return %arg0, %arg2 : i32, i32
  }
  func.func @transform_1(%arg0: i32, %arg1: i32, %arg2: i32) -> (i32, i32) {
    %c0_i32 = arith.constant 0 : i32
    return %arg2, %arg1 : i32, i32
  }
  func.func @transform_2(%arg0: i32, %arg1: i32, %arg2: i32) -> (i32, i32) {
    %c0_i32 = arith.constant 0 : i32
    %c0_i32_0 = arith.constant 0 : i32
    return %c0_i32, %arg1 : i32, i32
  }
  func.func @transform_3(%arg0: i32, %arg1: i32, %arg2: i32) -> (i32, i32) {
    %c0_i32 = arith.constant 0 : i32
    return %arg0, %arg1 : i32, i32
  }
}

module attributes {stable_mosaic.version = 11 : i64} {
  func.func @kernel(%arg0: i32, %arg1: memref<2x1xi32, #tpu.memory_space<vmem>>, %arg2: memref<1x2x128xf32, #tpu.memory_space<vmem>>, %arg3: memref<1x2x128xf32, #tpu.memory_space<vmem>>, %arg4: memref<64x256xf32, #tpu.memory_space<vmem>>, %arg5: memref<1x2x32xf32, #tpu.memory_space<vmem>>, %arg6: memref<1x2x32xf32, #tpu.memory_space<vmem>>, %arg7: memref<2x64xf32, #tpu.memory_space<vmem>>, %arg8: memref<2x32xf32, #tpu.memory_space<vmem>>, %arg9: memref<2x32xf32, #tpu.memory_space<vmem>>) attributes {dimension_semantics = [#tpu.dimension_semantics<arbitrary>], iteration_bounds = array<i64: 8>, scalar_prefetch = 0 : i64, scratch_operands = 3 : i64, tpu.core_type = #tpu.core_type<tc>, window_params = [{pipeline_mode = #tpu.pipeline_mode<synchronous>, transform_indices = @transform_0, window_bounds = array<i64: 2, 1>}, {transform_indices = @transform_1, window_bounds = array<i64: 1, 2, 128>}, {transform_indices = @transform_2, window_bounds = array<i64: 1, 2, 128>}, {pipeline_mode = #tpu.pipeline_mode<synchronous>, transform_indices = @transform_3, window_bounds = array<i64: 64, 256>}, {transform_indices = @transform_4, window_bounds = array<i64: 1, 2, 32>}, {transform_indices = @transform_5, window_bounds = array<i64: 1, 2, 32>}]} {
    %c0_i32 = arith.constant 0 : i32
    %0 = arith.cmpi eq, %arg0, %c0_i32 : i32
    %1 = arith.extui %0 : i1 to i32
    %c0_i32_0 = arith.constant 0 : i32
    %2 = arith.cmpi ne, %1, %c0_i32_0 : i32
    scf.if %2 {
      %cst_36 = arith.constant 0.000000e+00 : f32
      %103 = vector.broadcast %cst_36 : f32 to vector<2x64xf32>
      %c0_37 = arith.constant 0 : index
      %c0_38 = arith.constant 0 : index
      %104 = vector.load %arg7[%c0_37, %c0_38] : memref<2x64xf32, #tpu.memory_space<vmem>>, vector<2x64xf32>
      tpu.vector_store %arg7[%c0_37, %c0_38], %103 {strides = array<i32>} : memref<2x64xf32, #tpu.memory_space<vmem>>, vector<2x64xf32>,
      %cst_39 = arith.constant 0.000000e+00 : f32
      %105 = vector.broadcast %cst_39 : f32 to vector<2x32xf32>
      %c0_40 = arith.constant 0 : index
      %c0_41 = arith.constant 0 : index
      %106 = vector.load %arg8[%c0_40, %c0_41] : memref<2x32xf32, #tpu.memory_space<vmem>>, vector<2x32xf32>
      tpu.vector_store %arg8[%c0_40, %c0_41], %105 {strides = array<i32>} : memref<2x32xf32, #tpu.memory_space<vmem>>, vector<2x32xf32>,
      %cst_42 = arith.constant 0.000000e+00 : f32
      %107 = vector.broadcast %cst_42 : f32 to vector<2x32xf32>
      %c0_43 = arith.constant 0 : index
      %c0_44 = arith.constant 0 : index
      %108 = vector.load %arg9[%c0_43, %c0_44] : memref<2x32xf32, #tpu.memory_space<vmem>>, vector<2x32xf32>
      tpu.vector_store %arg9[%c0_43, %c0_44], %107 {strides = array<i32>} : memref<2x32xf32, #tpu.memory_space<vmem>>, vector<2x32xf32>,
    } else {
    }
    %c7_i32 = arith.constant 7 : i32
    %3 = arith.subi %c7_i32, %arg0 : i32
    %c0 = arith.constant 0 : index
    %c0_1 = arith.constant 0 : index
    %4 = vector.load %arg1[%c0, %c0_1] : memref<2x1xi32, #tpu.memory_space<vmem>>, vector<2x1xi32>
    %c0_2 = arith.constant 0 : index
    %c0_3 = arith.constant 0 : index
    %5 = vector.load %arg7[%c0_2, %c0_3] : memref<2x64xf32, #tpu.memory_space<vmem>>, vector<2x64xf32>
    %c0_4 = arith.constant 0 : index
    %c0_5 = arith.constant 0 : index
    %6 = vector.load %arg4[%c0_4, %c0_5] : memref<64x256xf32, #tpu.memory_space<vmem>>, vector<64x256xf32>
    %cst = arith.constant dense<0.000000e+00> : vector<2x256xf32>
    %7 = tpu.matmul %5, %6, %cst {dimension_numbers = #tpu.dot_dimension_numbers<[1], [0], [0], [1], [0, 0, 1, 1], [], []>} : vector<2x64xf32>, vector<64x256xf32>, vector<2x256xf32> -> vector<2x256xf32>
    %8 = vector.extract_strided_slice %7 {offsets = [0, 0], sizes = [2, 128], strides = [1, 1]} : vector<2x256xf32> to vector<2x128xf32>
    %9 = vector.extract_strided_slice %7 {offsets = [0, 128], sizes = [2, 128], strides = [1, 1]} : vector<2x256xf32> to vector<2x128xf32>
    %c0_6 = arith.constant 0 : index
    %c0_7 = arith.constant 0 : index
    %c0_8 = arith.constant 0 : index
    %10 = vector.load %arg2[%c0_6, %c0_7, %c0_8] : memref<1x2x128xf32, #tpu.memory_space<vmem>>, vector<1x2x128xf32>
    %11 = vector.shape_cast %10 : vector<1x2x128xf32> to vector<2x128xf32>
    %12 = arith.addf %11, %8 : vector<2x128xf32>
    %c0_9 = arith.constant 0 : index
    %c0_10 = arith.constant 0 : index
    %c0_11 = arith.constant 0 : index
    %13 = vector.load %arg3[%c0_9, %c0_10, %c0_11] : memref<1x2x128xf32, #tpu.memory_space<vmem>>, vector<1x2x128xf32>
    %14 = vector.shape_cast %13 : vector<1x2x128xf32> to vector<2x128xf32>
    %15 = arith.addf %14, %9 : vector<2x128xf32>
    %c0_12 = arith.constant 0 : index
    %c0_13 = arith.constant 0 : index
    %16 = vector.load %arg8[%c0_12, %c0_13] : memref<2x32xf32, #tpu.memory_space<vmem>>, vector<2x32xf32>
    %c0_14 = arith.constant 0 : index
    %c0_15 = arith.constant 0 : index
    %17 = vector.load %arg9[%c0_14, %c0_15] : memref<2x32xf32, #tpu.memory_space<vmem>>, vector<2x32xf32>
    %18 = vector.extract_strided_slice %12 {offsets = [0, 0], sizes = [2, 32], strides = [1, 1]} : vector<2x128xf32> to vector<2x32xf32>
    %19 = arith.negf %18 : vector<2x32xf32>
    %20 = math.exp %19 : vector<2x32xf32>
    %cst_16 = arith.constant 1.000000e+00 : f32
    %21 = vector.broadcast %cst_16 : f32 to vector<2x32xf32>
    %22 = arith.addf %21, %20 : vector<2x32xf32>
    %23 = arith.divf %21, %22 : vector<2x32xf32>
    %24 = vector.extract_strided_slice %12 {offsets = [0, 32], sizes = [2, 32], strides = [1, 1]} : vector<2x128xf32> to vector<2x32xf32>
    %25 = arith.negf %24 : vector<2x32xf32>
    %26 = math.exp %25 : vector<2x32xf32>
    %cst_17 = arith.constant 1.000000e+00 : f32
    %27 = vector.broadcast %cst_17 : f32 to vector<2x32xf32>
    %28 = arith.addf %27, %26 : vector<2x32xf32>
    %29 = arith.divf %27, %28 : vector<2x32xf32>
    %30 = vector.extract_strided_slice %12 {offsets = [0, 64], sizes = [2, 32], strides = [1, 1]} : vector<2x128xf32> to vector<2x32xf32>
    %31 = math.tanh %30 : vector<2x32xf32>
    %32 = vector.extract_strided_slice %12 {offsets = [0, 96], sizes = [2, 32], strides = [1, 1]} : vector<2x128xf32> to vector<2x32xf32>
    %33 = arith.negf %32 : vector<2x32xf32>
    %34 = math.exp %33 : vector<2x32xf32>
    %cst_18 = arith.constant 1.000000e+00 : f32
    %35 = vector.broadcast %cst_18 : f32 to vector<2x32xf32>
    %36 = arith.addf %35, %34 : vector<2x32xf32>
    %37 = arith.divf %35, %36 : vector<2x32xf32>
    %38 = arith.mulf %29, %16 : vector<2x32xf32>
    %39 = arith.mulf %23, %31 : vector<2x32xf32>
    %40 = arith.addf %38, %39 : vector<2x32xf32>
    %41 = math.tanh %40 : vector<2x32xf32>
    %42 = arith.mulf %37, %41 : vector<2x32xf32>
    %43 = vector.extract_strided_slice %15 {offsets = [0, 0], sizes = [2, 32], strides = [1, 1]} : vector<2x128xf32> to vector<2x32xf32>
    %44 = arith.negf %43 : vector<2x32xf32>
    %45 = math.exp %44 : vector<2x32xf32>
    %cst_19 = arith.constant 1.000000e+00 : f32
    %46 = vector.broadcast %cst_19 : f32 to vector<2x32xf32>
    %47 = arith.addf %46, %45 : vector<2x32xf32>
    %48 = arith.divf %46, %47 : vector<2x32xf32>
    %49 = vector.extract_strided_slice %15 {offsets = [0, 32], sizes = [2, 32], strides = [1, 1]} : vector<2x128xf32> to vector<2x32xf32>
    %50 = arith.negf %49 : vector<2x32xf32>
    %51 = math.exp %50 : vector<2x32xf32>
    %cst_20 = arith.constant 1.000000e+00 : f32
    %52 = vector.broadcast %cst_20 : f32 to vector<2x32xf32>
    %53 = arith.addf %52, %51 : vector<2x32xf32>
    %54 = arith.divf %52, %53 : vector<2x32xf32>
    %55 = vector.extract_strided_slice %15 {offsets = [0, 64], sizes = [2, 32], strides = [1, 1]} : vector<2x128xf32> to vector<2x32xf32>
    %56 = math.tanh %55 : vector<2x32xf32>
    %57 = vector.extract_strided_slice %15 {offsets = [0, 96], sizes = [2, 32], strides = [1, 1]} : vector<2x128xf32> to vector<2x32xf32>
    %58 = arith.negf %57 : vector<2x32xf32>
    %59 = math.exp %58 : vector<2x32xf32>
    %cst_21 = arith.constant 1.000000e+00 : f32
    %60 = vector.broadcast %cst_21 : f32 to vector<2x32xf32>
    %61 = arith.addf %60, %59 : vector<2x32xf32>
    %62 = arith.divf %60, %61 : vector<2x32xf32>
    %63 = arith.mulf %54, %17 : vector<2x32xf32>
    %64 = arith.mulf %48, %56 : vector<2x32xf32>
    %65 = arith.addf %63, %64 : vector<2x32xf32>
    %66 = math.tanh %65 : vector<2x32xf32>
    %67 = arith.mulf %62, %66 : vector<2x32xf32>
    %68 = vector.broadcast %arg0 : i32 to vector<2x1xi32>
    %69 = arith.cmpi slt, %68, %4 : vector<2x1xi32>
    %70 = vector.broadcast %3 : i32 to vector<2x1xi32>
    %71 = arith.cmpi slt, %70, %4 : vector<2x1xi32>
    %cst_22 = arith.constant 0.000000e+00 : f32
    %72 = vector.broadcast %cst_22 : f32 to vector<2x32xf32>
    %73 = vector.extract_strided_slice %5 {offsets = [0, 0], sizes = [2, 32], strides = [1, 1]} : vector<2x64xf32> to vector<2x32xf32>
    %74 = vector.shape_cast %69 : vector<2x1xi1> to vector<2x1xi1>
    %75 = vector.broadcast %74 : vector<2x1xi1> to vector<2x32xi1>
    %76 = arith.select %75, %42, %73 : vector<2x32xi1>, vector<2x32xf32>
    %c0_23 = arith.constant 0 : index
    %c0_24 = arith.constant 0 : index
    %77 = vector.load %arg7[%c0_23, %c0_24] : memref<2x64xf32, #tpu.memory_space<vmem>>, vector<2x32xf32>
    tpu.vector_store %arg7[%c0_23, %c0_24], %76 {strides = array<i32>} : memref<2x64xf32, #tpu.memory_space<vmem>>, vector<2x32xf32>,
    %78 = vector.extract_strided_slice %5 {offsets = [0, 32], sizes = [2, 32], strides = [1, 1]} : vector<2x64xf32> to vector<2x32xf32>
    %79 = vector.shape_cast %71 : vector<2x1xi1> to vector<2x1xi1>
    %80 = vector.broadcast %79 : vector<2x1xi1> to vector<2x32xi1>
    %81 = arith.select %80, %67, %78 : vector<2x32xi1>, vector<2x32xf32>
    %c0_25 = arith.constant 0 : index
    %c32 = arith.constant 32 : index
    %82 = vector.load %arg7[%c0_25, %c32] : memref<2x64xf32, #tpu.memory_space<vmem>>, vector<2x32xf32>
    tpu.vector_store %arg7[%c0_25, %c32], %81 {strides = array<i32>} : memref<2x64xf32, #tpu.memory_space<vmem>>, vector<2x32xf32>,
    %83 = vector.shape_cast %69 : vector<2x1xi1> to vector<2x1xi1>
    %84 = vector.broadcast %83 : vector<2x1xi1> to vector<2x32xi1>
    %85 = arith.select %84, %40, %16 : vector<2x32xi1>, vector<2x32xf32>
    %c0_26 = arith.constant 0 : index
    %c0_27 = arith.constant 0 : index
    %86 = vector.load %arg8[%c0_26, %c0_27] : memref<2x32xf32, #tpu.memory_space<vmem>>, vector<2x32xf32>
    tpu.vector_store %arg8[%c0_26, %c0_27], %85 {strides = array<i32>} : memref<2x32xf32, #tpu.memory_space<vmem>>, vector<2x32xf32>,
    %87 = vector.shape_cast %71 : vector<2x1xi1> to vector<2x1xi1>
    %88 = vector.broadcast %87 : vector<2x1xi1> to vector<2x32xi1>
    %89 = arith.select %88, %65, %17 : vector<2x32xi1>, vector<2x32xf32>
    %c0_28 = arith.constant 0 : index
    %c0_29 = arith.constant 0 : index
    %90 = vector.load %arg9[%c0_28, %c0_29] : memref<2x32xf32, #tpu.memory_space<vmem>>, vector<2x32xf32>
    tpu.vector_store %arg9[%c0_28, %c0_29], %89 {strides = array<i32>} : memref<2x32xf32, #tpu.memory_space<vmem>>, vector<2x32xf32>,
    %91 = vector.shape_cast %69 : vector<2x1xi1> to vector<2x1xi1>
    %92 = vector.broadcast %91 : vector<2x1xi1> to vector<2x32xi1>
    %93 = arith.select %92, %42, %72 : vector<2x32xi1>, vector<2x32xf32>
    %c0_30 = arith.constant 0 : index
    %c0_31 = arith.constant 0 : index
    %c0_32 = arith.constant 0 : index
    %94 = vector.load %arg5[%c0_30, %c0_31, %c0_32] : memref<1x2x32xf32, #tpu.memory_space<vmem>>, vector<1x2x32xf32>
    %95 = vector.shape_cast %94 : vector<1x2x32xf32> to vector<2x32xf32>
    %96 = vector.shape_cast %93 : vector<2x32xf32> to vector<1x2x32xf32>
    tpu.vector_store %arg5[%c0_30, %c0_31, %c0_32], %96 {strides = array<i32>} : memref<1x2x32xf32, #tpu.memory_space<vmem>>, vector<1x2x32xf32>,
    %97 = vector.shape_cast %71 : vector<2x1xi1> to vector<2x1xi1>
    %98 = vector.broadcast %97 : vector<2x1xi1> to vector<2x32xi1>
    %99 = arith.select %98, %67, %72 : vector<2x32xi1>, vector<2x32xf32>
    %c0_33 = arith.constant 0 : index
    %c0_34 = arith.constant 0 : index
    %c0_35 = arith.constant 0 : index
    %100 = vector.load %arg6[%c0_33, %c0_34, %c0_35] : memref<1x2x32xf32, #tpu.memory_space<vmem>>, vector<1x2x32xf32>
    %101 = vector.shape_cast %100 : vector<1x2x32xf32> to vector<2x32xf32>
    %102 = vector.shape_cast %99 : vector<2x32xf32> to vector<1x2x32xf32>
    tpu.vector_store %arg6[%c0_33, %c0_34, %c0_35], %102 {strides = array<i32>} : memref<1x2x32xf32, #tpu.memory_space<vmem>>, vector<1x2x32xf32>,
    return
  }
  func.func @transform_0(%arg0: i32) -> (i32, i32) {
    %c0_i32 = arith.constant 0 : i32
    %c0_i32_0 = arith.constant 0 : i32
    %c0_i32_1 = arith.constant 0 : i32
    return %c0_i32, %c0_i32_0 : i32, i32
  }
  func.func @transform_1(%arg0: i32) -> (i32, i32, i32) {
    %c0_i32 = arith.constant 0 : i32
    %c0_i32_0 = arith.constant 0 : i32
    %c0_i32_1 = arith.constant 0 : i32
    return %arg0, %c0_i32, %c0_i32_0 : i32, i32, i32
  }
  func.func @transform_2(%arg0: i32) -> (i32, i32, i32) {
    %c7_i32 = arith.constant 7 : i32
    %0 = arith.subi %c7_i32, %arg0 : i32
    %c0_i32 = arith.constant 0 : i32
    %c1_i32 = arith.constant 1 : i32
    %c0_i32_0 = arith.constant 0 : i32
    return %0, %c0_i32, %c1_i32 : i32, i32, i32
  }
  func.func @transform_3(%arg0: i32) -> (i32, i32) {
    %c0_i32 = arith.constant 0 : i32
    %c0_i32_0 = arith.constant 0 : i32
    %c0_i32_1 = arith.constant 0 : i32
    return %c0_i32, %c0_i32_0 : i32, i32
  }
  func.func @transform_4(%arg0: i32) -> (i32, i32, i32) {
    %c0_i32 = arith.constant 0 : i32
    %c0_i32_0 = arith.constant 0 : i32
    %c0_i32_1 = arith.constant 0 : i32
    return %arg0, %c0_i32, %c0_i32_0 : i32, i32, i32
  }
  func.func @transform_5(%arg0: i32) -> (i32, i32, i32) {
    %c7_i32 = arith.constant 7 : i32
    %0 = arith.subi %c7_i32, %arg0 : i32
    %c0_i32 = arith.constant 0 : i32
    %c0_i32_0 = arith.constant 0 : i32
    %c0_i32_1 = arith.constant 0 : i32
    return %0, %c0_i32, %c0_i32_0 : i32, i32, i32
  }
}

</mosaic_0001>

<bundles_post_ra>
// kernel: encoder_forward.4
= control target key start
LH: loop header
LB: loop body
LE: loop exit
PB: predicated region body
PF: predicated region fallthrough
CT: control target
= control target key end

     0   :  { %v184_v3 = vmov 0.0   ;;  %vm40_vm0 = vcmask 392192   ;;  %v141_v21 = vlaneseq  ;;  %s262_s1 = inlined_call_operand.vmem [shape: f32[48,256], index: 1, kind: input, shape index: {}]   ;;  %s263_s0 = inlined_call_operand.vmem [shape: f32[16,48], index: 0, kind: input, shape index: {}]   ;;  %s264_s2 = inlined_call_operand.vmem [shape: f32[1,256], index: 2, kind: input, shape index: {}]   ;;  %s265_s3 = inlined_call_operand.vmem [shape: f32[16,256], index: 3, kind: output, shape index: {}]  }
   0x1   :  { %v29_v0 = vld [vmem:[%s262_s1 + $0x8] sm:$0xff]  ;;  %v31_v1 = vld [vmem:[%s262_s1 + $0x18] sm:$0xff]  ;;  %v28_v2 = vld [vmem:[%s262_s1] sm:$0xff]  ;;  %111 = vmatprep.mubr.f32.mxu0 %v184_v3  ;;  %117 = vmatprep.mubr.f32.mxu1 %v184_v3 }
   0x2   :  { %v165_v4 = vpack.c.bf16 %v31_v1, %v29_v0  ;;  %v30_v5 = vld [vmem:[%s262_s1 + $0x10] sm:$0xff]  ;;  %v33_v6 = vld [vmem:[%s262_s1 + $0x28] sm:$0xff]  ;;  %v35_v7 = vld [vmem:[%s262_s1 + $0x38] sm:$0xff]  ;;  %v142_v22 = vshrl.u32 %v141_v21, 7 }
   0x3   :  { %v167_v8 = vpack.c.bf16 %v30_v5, %v28_v2  ;;  %v169_v9 = vpack.c.bf16 %v35_v7, %v33_v6  ;;  %v32_v10 = vld [vmem:[%s262_s1 + $0x20] sm:$0xff]  ;;  %v34_v11 = vld [vmem:[%s262_s1 + $0x30] sm:$0xff]  ;;  %v37_v12 = vld [vmem:[%s262_s1 + $0x48] sm:$0xff] }
   0x4   :  { %166 = vmatprep.subr.bf16.mxu0 %v165_v4  ;;  %177 = vmatprep.subr.bf16.mxu1 %v165_v4  ;;  %v39_v13 = vld [vmem:[%s262_s1 + $0x58] sm:$0xff]  ;;  %v171_v14 = vpack.c.bf16 %v34_v11, %v32_v10  ;;  %v36_v16 = vld [vmem:[%s262_s1 + $0x40] sm:$0xff]  ;;  %v38_v17 = vld [vmem:[%s262_s1 + $0x50] sm:$0xff]  ;;  %v143_v23 = vsub.s32 0, %v142_v22  ;;  %v147_v25 = vsub.s32 1, %v142_v22 }
   0x5   :  { %168 = vmatpush1.bf16.msra.mxu0 %v167_v8  ;;  %180 = vmatpush1.bf16.msra.mxu1 %v167_v8  ;;  %v173_v15 = vpack.c.bf16 %v39_v13, %v37_v12  ;;  %v175_v18 = vpack.c.bf16 %v38_v17, %v36_v16  ;;  %v26_v19 = vld [vmem:[%s263_s0] sm:$0xff]  ;;  %v27_v20 = vld [vmem:[%s263_s0 + $0x8] sm:$0xff] }
   0x6   :  { %170 = vmatprep.subr.bf16.mxu0 %v169_v9  ;;  %178 = vmatprep.subr.bf16.mxu1 %v169_v9  ;;  %v139_v24 = vld [vmem:[%s264_s2] sm:$0x3] }
   0x7   :  { %v144_v26 = vrot.slane %v139_v24, %v143_v23  ;;  %v148_v27 = vrot.slane %v139_v24, %v147_v25 }
   0x9   :  { %172 = vmatpush1.bf16.msra.mxu0 %v171_v14  ;;  %181 = vmatpush1.bf16.msra.mxu1 %v171_v14 }
   0xa   :  { %174 = vmatprep.subr.bf16.mxu0 %v173_v15  ;;  %179 = vmatprep.subr.bf16.mxu1 %v173_v15 }
   0xd   :  { %176 = vmatpush1.bf16.msra.mxu0 %v175_v18  ;;  %182 = vmatpush1.bf16.msra.mxu1 %v175_v18 }
  0x10   :  { %163 = vmatmul.mubr.msk.f32.vlgmr.msra.gmra.mrb[0].mxu0 %vm40_vm0, %v26_v19  ;;  %164 = vmatmul.mubr.msk.f32.vlgmr.msra.gmra.mrb[0].mxu1 %vm40_vm0, %v27_v20 }
  0xe3   :  { %v113_v28 = vpop.f32.mrb[0].mxu0  ;;  %v119_v29 = vpop.f32.mrb[0].mxu1 }
  0xe4   :  { %v151_v30 = vadd.f32 %v144_v26, %v113_v28  ;;  %v153_v31 = vadd.f32 %v144_v26, %v119_v29  ;;  %v115_v32 = vpop.f32.mrb[1].mxu0  ;;  %v121_v33 = vpop.f32.mrb[1].mxu1 }
  0xe5   :  { %v152_v34 = vadd.f32 %v148_v27, %v115_v32  ;;  %v154_v35 = vadd.f32 %v148_v27, %v121_v33 }
  0xe6   :  { %155 = vst [vmem:[%s265_s3] sm:$0xff] %v151_v30  ;;  %157 = vst [vmem:[%s265_s3 + $0x10] sm:$0xff] %v153_v31 }
  0xe7   :  { %156 = vst [vmem:[%s265_s3 + $0x8] sm:$0xff] %v152_v34  ;;  %158 = vst [vmem:[%s265_s3 + $0x18] sm:$0xff] %v154_v35 }

// kernel: encoder_forward.3
= control target key start
LH: loop header
LB: loop body
LE: loop exit
PB: predicated region body
PF: predicated region fallthrough
CT: control target
= control target key end

     0   :  { %vm20_vm0 = vcmask 261120   ;;  %vm629_vm1 = vcmask 130048   ;;  %s935_s1 = inlined_call_operand.vmem [shape: f32[32,16], index: 1, kind: input, shape index: {}]   ;;  %s936_s0 = inlined_call_operand.vmem [shape: f32[7,16,32], index: 0, kind: input, shape index: {}]   ;;  %s937_s2 = inlined_call_operand.vmem [shape: f32[1,16], index: 2, kind: input, shape index: {}]   ;;  %s938_s3 = inlined_call_operand.vmem [shape: f32[16,16], index: 3, kind: output, shape index: {}]  }
   0x1   :  { %v14_v0 = vld [vmem:[%s935_s1] sm:$0xff]  ;;  %v15_v1 = vld [vmem:[%s935_s1 + $0x8] sm:$0xff]  ;;  %v16_v2 = vld [vmem:[%s935_s1 + $0x10] sm:$0xff] }
   0x2   :  { %v782_v3 = vpack.c.bf16 %v15_v1, %v14_v0  ;;  %v17_v4 = vld [vmem:[%s935_s1 + $0x18] sm:$0xff]  ;;  %v18_v5 = vld [vmem:[%s936_s0] sm:$0xff]  ;;  %v638_v6 = vld [vmem:[%s936_s0 + $0x10] sm:$0xff] }
   0x3   :  { %v786_v7 = vpack.c.bf16 %v17_v4, %v16_v2  ;;  %713 = vmatprep.mubr.msk.f32.mxu0 %vm20_vm0, %v18_v5  ;;  %724 = vmatprep.mubr.msk.f32.mxu1 %vm20_vm0, %v638_v6  ;;  %v19_v8 = vld [vmem:[%s936_s0 + $0x8] sm:$0xff]  ;;  %v639_v9 = vld [vmem:[%s936_s0 + $0x18] sm:$0xff]  ;;  %v642_v10 = vld [vmem:[%s936_s0 + $0x20] sm:$0xff] }
   0x4   :  { %783 = vmatprep.subr.bf16.mxu0 %v782_v3  ;;  %791 = vmatprep.subr.bf16.mxu1 %v782_v3  ;;  %v646_v11 = vld [vmem:[%s936_s0 + $0x30] sm:$0xff]  ;;  %v643_v12 = vld [vmem:[%s936_s0 + $0x28] sm:$0xff]  ;;  %v647_v13 = vld [vmem:[%s936_s0 + $0x38] sm:$0xff] }
   0x5   :  { %785 = vmatpush3.bf16.msra.mxu0 %v782_v3  ;;  %793 = vmatpush3.bf16.msra.mxu1 %v782_v3  ;;  %v650_v14 = vld [vmem:[%s936_s0 + $0x40] sm:$0xff]  ;;  %v654_v15 = vld [vmem:[%s936_s0 + $0x50] sm:$0xff]  ;;  %v651_v16 = vld [vmem:[%s936_s0 + $0x48] sm:$0xff] }
   0x6   :  { %787 = vmatprep.subr.bf16.mxu0 %v786_v7  ;;  %795 = vmatprep.subr.bf16.mxu1 %v786_v7  ;;  %v655_v17 = vld [vmem:[%s936_s0 + $0x58] sm:$0xff]  ;;  %v658_v18 = vld [vmem:[%s936_s0 + $0x60] sm:$0xff]  ;;  %v659_v19 = vld [vmem:[%s936_s0 + $0x68] sm:$0xff] }
   0x7   :  { %v662_v43 = vld [vmem:[%s937_s2] ss:$0 sm:$0xff] }
   0x9   :  { %789 = vmatpush3.bf16.msra.mxu0 %v786_v7  ;;  %797 = vmatpush3.bf16.msra.mxu1 %v786_v7 }
   0xa   :  { %799 = vmatprep.subr.bf16.mxu0 %v782_v3  ;;  %807 = vmatprep.subr.bf16.mxu1 %v782_v3 }
   0xc   :  { %714 = vmatmul.mubr.msk.f32.vlgmr.msra.gmra.mrb[0].mxu0 %vm20_vm0, %v19_v8  ;;  %725 = vmatmul.mubr.msk.f32.vlgmr.msra.gmra.mrb[0].mxu1 %vm20_vm0, %v639_v9 }
   0xd   :  { %801 = vmatpush3.bf16.msra.mxu0 %v782_v3  ;;  %809 = vmatpush3.bf16.msra.mxu1 %v782_v3 }
   0xe   :  { %803 = vmatprep.subr.bf16.mxu0 %v786_v7  ;;  %811 = vmatprep.subr.bf16.mxu1 %v786_v7 }
   0xf   :  { %735 = vmatprep.mubr.msk.f32.mxu0 %vm20_vm0, %v642_v10  ;;  %746 = vmatprep.mubr.msk.f32.mxu1 %vm20_vm0, %v646_v11 }
  0x11   :  { %805 = vmatpush3.bf16.msra.mxu0 %v786_v7  ;;  %813 = vmatpush3.bf16.msra.mxu1 %v786_v7 }
  0x12   :  { %815 = vmatprep.subr.bf16.mxu0 %v782_v3  ;;  %823 = vmatprep.subr.bf16.mxu1 %v782_v3 }
  0x14   :  { %736 = vmatmul.mubr.msk.f32.vlgmr.msra.gmra.mrb[2].mxu0 %vm20_vm0, %v643_v12  ;;  %747 = vmatmul.mubr.msk.f32.vlgmr.msra.gmra.mrb[2].mxu1 %vm20_vm0, %v647_v13 }
  0x15   :  { %817 = vmatpush3.bf16.msra.mxu0 %v782_v3  ;;  %825 = vmatpush3.bf16.msra.mxu1 %v782_v3 }
  0x16   :  { %819 = vmatprep.subr.bf16.mxu0 %v786_v7  ;;  %827 = vmatprep.subr.bf16.mxu1 %v786_v7 }
  0x17   :  { %757 = vmatprep.mubr.msk.f32.mxu0 %vm20_vm0, %v650_v14  ;;  %768 = vmatprep.mubr.msk.f32.mxu1 %vm20_vm0, %v654_v15 }
  0x19   :  { %821 = vmatpush3.bf16.msra.mxu0 %v786_v7  ;;  %829 = vmatpush3.bf16.msra.mxu1 %v786_v7 }
  0x1a   :  { %831 = vmatprep.subr.bf16.mxu0 %v782_v3 }
  0x1c   :  { %758 = vmatmul.mubr.msk.f32.vlgmr.msra.gmra.mrb[4].mxu0 %vm20_vm0, %v651_v16  ;;  %769 = vmatmul.mubr.msk.f32.vlgmr.msra.gmra.mrb[4].mxu1 %vm20_vm0, %v655_v17 }
  0x1d   :  { %833 = vmatpush3.bf16.msra.mxu0 %v782_v3  ;;  %779 = vmatprep.mubr.msk.f32.mxu0 %vm20_vm0, %v658_v18 }
  0x1e   :  { %835 = vmatprep.subr.bf16.mxu0 %v786_v7 }
  0x21   :  { %837 = vmatpush3.bf16.msra.mxu0 %v786_v7 }
  0x24   :  { %780 = vmatmul.mubr.msk.f32.vlgmr.msra.gmra.mrb[6].mxu0 %vm20_vm0, %v659_v19 }
  0xdf   :  { %v715_v20 = vpop.f32.mrb[0].mxu0  ;;  %v726_v21 = vpop.f32.mrb[0].mxu1 }
  0xe0   :  { %v187_v22 = vmax.f32 %v715_v20, %v726_v21  ;;  %v93_v23 = vpop.f32.mrb[1].mxu0  ;;  %v177_v24 = vpop.f32.mrb[1].mxu1 }
  0xe1   :  { %v186_v25 = vmax.f32 %v93_v23, %v177_v24 }
  0xe7   :  { %v737_v26 = vpop.f32.mrb[2].mxu0  ;;  %v748_v27 = vpop.f32.mrb[2].mxu1 }
  0xe8   :  { %v273_v28 = vmax.f32 %v187_v22, %v737_v26  ;;  %v263_v29 = vpop.f32.mrb[3].mxu0  ;;  %v349_v30 = vpop.f32.mrb[3].mxu1 }
  0xe9   :  { %v272_v31 = vmax.f32 %v186_v25, %v263_v29 }
  0xea   :  { %v359_v32 = vmax.f32 %v273_v28, %v748_v27 }
  0xeb   :  { %v358_v33 = vmax.f32 %v272_v31, %v349_v30 }
  0xef   :  { %v759_v34 = vpop.f32.mrb[4].mxu0  ;;  %v770_v35 = vpop.f32.mrb[4].mxu1 }
  0xf0   :  { %v445_v36 = vmax.f32 %v359_v32, %v759_v34  ;;  %v435_v37 = vpop.f32.mrb[5].mxu0  ;;  %v521_v38 = vpop.f32.mrb[5].mxu1 }
  0xf1   :  { %v444_v39 = vmax.f32 %v358_v33, %v435_v37 }
  0xf2   :  { %v531_v40 = vmax.f32 %v445_v36, %v770_v35 }
  0xf3   :  { %v530_v41 = vmax.f32 %v444_v39, %v521_v38 }
  0xf7   :  { %v781_v42 = vpop.f32.mrb[6].mxu0 }
  0xf8   :  { %v617_v44 = vmax.f32 %v531_v40, %v781_v42  ;;  %v607_v45 = vpop.f32.mrb[7].mxu0 }
  0xf9   :  { %v616_v46 = vmax.f32 %v530_v41, %v607_v45 }
  0xfa   :  { %v626_v47 = vadd.f32 %v662_v43, %v617_v44 }
  0xfb   :  { %v625_v48 = vadd.f32 %v662_v43, %v616_v46 }
  0xfc   :  { %v628_v49 = vmax.f32 %v626_v47, 0.0 }
  0xfd   :  { %v627_v50 = vmax.f32 %v625_v48, 0.0 }
  0xfe   :  { %631 = vst.msk [vmem:[%s938_s3 + $0x8] sm:$0xff] %vm629_vm1, %v628_v49 }
  0xff   :  { %630 = vst.msk [vmem:[%s938_s3] sm:$0xff] %vm629_vm1, %v627_v50 }

// kernel: encoder_forward.5
= control target key start
LH: loop header
LB: loop body
LE: loop exit
PB: predicated region body
PF: predicated region fallthrough
CT: control target
= control target key end

     0   :  { %s709_s18 = smov 0   ;;  %s836_s0 = inlined_call_operand.vmem [shape: s32[2,1], index: 0, kind: input, shape index: {}]   ;;  %s837_s1 = inlined_call_operand.vmem [shape: f32[8,2,256], index: 1, kind: input, shape index: {}, may-alias: {1,2}]   ;;  %s838_s2 = inlined_call_operand.vmem [shape: f32[8,2,256], index: 2, kind: input, shape index: {}, may-alias: {1,2}]   ;;  %s839_s3 = inlined_call_operand.vmem [shape: f32[64,256], index: 3, kind: input, shape index: {}]   ;;  %s840_s4 = inlined_call_operand.vmem [shape: f32[8,2,32], index: 4, kind: output, shape index: {0}]   ;;  %s841_s5 = inlined_call_operand.vmem [shape: f32[8,2,32], index: 5, kind: output, shape index: {1}]  }
   0x1 LB: > { %s715_s19 = sadd.s32 4294967295, %s671_s18   ;;  %p601_p0 = scmp.ge.s32.totalorder %s671_s18, 1  ;;  %s671_s18 = sphi %s709_s18, %s16_s18  }
   0x2   : > { %p207_p1 = scmp.lt.s32.totalorder %s671_s18, 9 }
   0x4   : > { %p208_p2 = pnand %p601_p0, %p207_p1 }
   0x5   : > { %p246_p3 = scmp.lt.s32.totalorder (!%p208_p2), %s715_s19, 7  ;;  %s721_s20 = ssub.s32 (!%p208_p2), 7, %s715_s19 }
   0x6   : > { %211 = sbr.rel (%p208_p2) target bundleno = 758 (0x2f6), region = 36  ;;  %p252_p4 = scmp.lt.s32.totalorder (!%p208_p2), %s721_s20, 7 }
   0x7   : > { %p608_p5 = scmp.ne.s32.totalorder (!%p208_p2), %s715_s19, 0 }
   0xd   : > { %s247_s21 = scalar_select %p246_p3, %s715_s19, 7 }
   0xe   : > { %s253_s22 = scalar_select %p252_p4, %s721_s20, 7 }
   0xf   : > { %s615_s23 = sshll.u32 %s247_s21, 2  ;;  %s606_s24 = sshll.u32 %s247_s21, 1  ;;  %vm273_vm0 = vcmask (!%p608_p5), 517120   ;;  %vm275_vm1 = vcmask (!%p608_p5), 254976   ;;  %v673_v0 = vmov (!%p608_p5), 0.0  }
  0x10   : > { %s729_s27 = scalar_lea.vmem %s837_s1, %s615_s23  ;;  %s616_s28 = sshll.u32 %s253_s22, 2  ;;  %274 = vst.msk [vmem:[#allocation2] sm:$0x3] (!%p608_p5), %vm273_vm0, %v673_v0 }
  0x11   : > { %s734_s6 = scalar_lea.vmem %s838_s2, %s616_s28  ;;  %s739_s9 = scalar_lea.vmem %s840_s4, %s606_s24  ;;  %276 = vst.msk [vmem:[#allocation3] sm:$0x3] (!%p608_p5), %vm275_vm1, %v673_v0  ;;  %277 = vst.msk [vmem:[#allocation4] sm:$0x3] (!%p608_p5), %vm275_vm1, %v673_v0 }
  0x12   : > { %s607_s10 = sshll.u32 %s253_s22, 1  ;;  %272 = sbr.rel (%p608_p5) target bundleno = 25 (0x19), region = 40 }
  0x13   : > { %s744_s13 = scalar_lea.vmem %s841_s5, %s607_s10 }
  0x19 PF: > { %v282_v1 = vld [vmem:[%s839_s3 + $0x8] sm:$0xff]  ;;  %v284_v2 = vld [vmem:[%s839_s3 + $0x18] sm:$0xff]  ;;  %v281_v3 = vld [vmem:[%s839_s3] sm:$0xff]  ;;  %v674_v8 = vmov 0.0   ;;  %s675_s28 = smov 32   ;;  %vm297_vm2 = vcmask 523264   ;;  %v434_v45 = vstv %s715_s19 }
  0x1a   : > { %v617_v4 = vpack.c.bf16 %v284_v2, %v282_v1  ;;  %v283_v5 = vld [vmem:[%s839_s3 + $0x10] sm:$0xff]  ;;  %v286_v6 = vld [vmem:[%s839_s3 + $0x28] sm:$0xff]  ;;  %v288_v7 = vld [vmem:[%s839_s3 + $0x38] sm:$0xff]  ;;  %365 = vmatprep.mubr.f32.mxu0 %v674_v8  ;;  %v676_v35 = vmov 0   ;;  %s677_s10 = smov 64   ;;  %v436_v49 = vstv %s721_s20  ;;  %s678_s19 = smov 96  }
  0x1b   : > { %v619_v9 = vpack.c.bf16 %v283_v5, %v281_v3  ;;  %v621_v10 = vpack.c.bf16 %v288_v7, %v286_v6  ;;  %v285_v11 = vld [vmem:[%s839_s3 + $0x20] sm:$0xff]  ;;  %v287_v12 = vld [vmem:[%s839_s3 + $0x30] sm:$0xff]  ;;  %v290_v13 = vld [vmem:[%s839_s3 + $0x48] sm:$0xff]  ;;  %647 = vset.pattern.permute.xlu0 %v676_v35  ;;  %648 = vset.pattern.permute.xlu1 %v676_v35  ;;  %vm451_vm7 = vcmask 254976   ;;  %vm466_vm8 = vcmask 517376  }
  0x1c   : > { %618 = vmatprep.subr.bf16.mxu0 %v617_v4  ;;  %v292_v14 = vld [vmem:[%s839_s3 + $0x58] sm:$0xff]  ;;  %v623_v15 = vpack.c.bf16 %v287_v12, %v285_v11  ;;  %v289_v17 = vld [vmem:[%s839_s3 + $0x40] sm:$0xff]  ;;  %v291_v18 = vld [vmem:[%s839_s3 + $0x50] sm:$0xff] }
  0x1d   : > { %620 = vmatpush1.bf16.msra.mxu0 %v619_v9  ;;  %v625_v16 = vpack.c.bf16 %v292_v14, %v290_v13  ;;  %v376_v19 = vld [vmem:[#allocation3] sm:$0x3]  ;;  %v294_v20 = vld [vmem:[%s839_s3 + $0x68] sm:$0xff]  ;;  %v296_v21 = vld [vmem:[%s839_s3 + $0x78] sm:$0xff]  ;;  %v627_v23 = vpack.c.bf16 %v291_v18, %v289_v17 }
  0x1e   : > { %622 = vmatprep.subr.bf16.mxu0 %v621_v10  ;;  %386 = vrot.lane.b32.xlu1 %v376_v19, %s675_s28  ;;  %v377_v22 = vld [vmem:[#allocation4] sm:$0x3]  ;;  %v629_v24 = vpack.c.bf16 %v296_v21, %v294_v20  ;;  %v295_v26 = vld [vmem:[%s839_s3 + $0x70] sm:$0xff]  ;;  %v797_v28 = vld [vmem:[#allocation2] sm:$0x3] }
  0x1f   : > { %v293_v25 = vld [vmem:[%s839_s3 + $0x60] sm:$0xff] }
  0x20   : > { %v631_v27 = vpack.c.bf16 %v295_v26, %v293_v25  ;;  %v372_v29 = vld [vmem:[%s729_s27] sm:$0x3]  ;;  %v610_v31 = vld [vmem:[%s734_s6 + $0x2] sm:$0x3] }
  0x21   : > { %624 = vmatpush1.bf16.msra.mxu0 %v623_v15  ;;  %v279_v44 = vld [vmem:[%s836_s0] sm:$0x3] }
  0x22   : > { %626 = vmatprep.subr.bf16.mxu0 %v625_v16  ;;  %414 = vrot.lane.b32.xlu1 %v377_v22, %s675_s28  ;;  %vm435_vm3 = vcmp.lt.s32.totalorder %v434_v45, %v279_v44  ;;  %vm437_vm4 = vcmp.lt.s32.totalorder %v436_v49, %v279_v44 }
  0x23   : > { %v438_v52 = vsel %vm435_vm3, 1, %v676_v35  ;;  %v453_v54 = vsel %vm437_vm4, 1, %v676_v35 }
  0x25   : > { %628 = vmatpush1.bf16.msra.mxu0 %v627_v23 }
  0x26   : > { %630 = vmatprep.subr.bf16.mxu0 %v629_v24 }
  0x29   : > { %632 = vmatpush1.bf16.msra.mxu0 %v631_v27 }
  0x2c   : > { %609 = vmatmul.mubr.msk.f32.vlgmr.msra.gmra.mrb[0].mxu0 %vm297_vm2, %v797_v28 }
  0x90   : > { %v387_v55 = vpop.permute.xlu1 %386 }
  0x94   : > { %v415_v57 = vpop.permute.xlu1 %414 }
  0xff   : > { %v367_v30 = vpop.f32.mrb[0].mxu0 }
 0x100   : > { %v373_v32 = vadd.f32 %v372_v29, %v367_v30  ;;  %v369_v33 = vpop.f32.mrb[1].mxu0 }
 0x101   : > { %v375_v34 = vadd.f32 %v610_v31, %v369_v33 }
 0x102   : > { %649 = vtanh.f32 %v373_v32  ;;  %v611_v38 = vmul.f32 -1.442695, %v373_v32 }
 0x103   : > { %651 = vtanh.f32 %v375_v34  ;;  %v612_v39 = vmul.f32 -1.442695, %v375_v34 }
 0x104   : > { %653 = vpow2.f32 %v611_v38 }
 0x105   : > { %655 = vpow2.f32 %v612_v39 }
 0x10c   : > { %v650_v36 = vpop.eup %649 }
 0x10d   : > { %391 = vrot.lane.b32.xlu0 %v650_v36, %s677_s10  ;;  %v652_v37 = vpop.eup %651 }
 0x10e   : > { %v654_v40 = vpop.eup %653 }
 0x10f   : > { %v381_v41 = vadd.f32 1.0, %v654_v40  ;;  %v656_v42 = vpop.eup %655 }
 0x110   : > { %v409_v43 = vadd.f32 1.0, %v656_v42 }
 0x111   : > { %419 = vrot.lane.b32.xlu0 %v652_v37, %s677_s10  ;;  %657 = vrcp.f32 %v381_v41 }
 0x112   : > { %659 = vrcp.f32 %v409_v43 }
 0x11b   : > { %v658_v46 = vpop.eup %657 }
 0x11c   : > { %v660_v50 = vpop.eup %659  ;;  %v389_v56 = vmul.f32 %v658_v46, %v387_v55 }
 0x11d   : > { %v417_v60 = vmul.f32 %v660_v50, %v415_v57 }
 0x17f   : > { %v392_v47 = vpop.permute.xlu0 %391 }
 0x180   : > { %v394_v48 = vmul.f32 %v658_v46, %v392_v47 }
 0x182   : > { %396 = vrot.lane.b32.xlu0 %v394_v48, %s675_s28 }
 0x183   : > { %v420_v51 = vpop.permute.xlu0 %419 }
 0x184   : > { %v422_v53 = vmul.f32 %v660_v50, %v420_v51 }
 0x186   : > { %424 = vrot.lane.b32.xlu1 %v422_v53, %s675_s28  ;;  %440 = vperm.xlu0 %647, %v438_v52  }
 0x18a   : > { %455 = vperm.xlu1 %648, %v453_v54  }
 0x1f4   : > { %v397_v58 = vpop.permute.xlu0 %396 }
 0x1f5   : > { %v399_v59 = vadd.f32 %v397_v58, %v389_v56 }
 0x1f7   : > { %661 = vtanh.f32 %v399_v59 }
 0x1f8   : > { %v425_v61 = vpop.permute.xlu1 %424 }
 0x1f9   : > { %v427_v62 = vadd.f32 %v425_v61, %v417_v60 }
 0x1fb   : > { %663 = vtanh.f32 %v427_v62 }
 0x201   : > { %v662_v63 = vpop.eup %661 }
 0x202   : > { %402 = vrot.lane.b32.xlu1 %v662_v63, %s677_s10 }
 0x205   : > { %v664_v0 = vpop.eup %663  ;;  %v441_v1 = vpop.permute.xlu0 %440 }
 0x206   : > { %vm442_vm5 = vcmp.eq.s32.totalorder %v441_v1, 1  ;;  %443 = vrot.lane.b32.xlu1 %v797_v28, %s678_s19  ;;  %430 = vrot.lane.b32.xlu0 %v664_v0, %s677_s10 }
 0x207   : > { %v468_v3 = vsel %vm442_vm5, %v399_v59, %v387_v55 }
 0x209   : > { %v456_v2 = vpop.permute.xlu1 %455 }
 0x20a   : > { %vm457_vm6 = vcmp.eq.s32.totalorder %v456_v2, 1  ;;  %458 = vrot.lane.b32.xlu0 %v797_v28, %s677_s10  ;;  %470 = vrot.lane.b32.xlu1 %v468_v3, %s678_s19 }
 0x20b   : > { %v474_v4 = vsel %vm457_vm6, %v427_v62, %v415_v57 }
 0x20e   : > { %476 = vrot.lane.b32.xlu0 %v474_v4, %s678_s19 }
 0x274   : > { %v403_v5 = vpop.permute.xlu1 %402 }
 0x275   : > { %v405_v6 = vmul.f32 %v658_v46, %v403_v5 }
 0x277   : > { %v480_v13 = vsel %vm442_vm5, %v405_v6, 0.0 }
 0x278   : > { %v444_v7 = vpop.permute.xlu1 %443  ;;  %v431_v8 = vpop.permute.xlu0 %430 }
 0x279   : > { %v446_v9 = vsel %vm442_vm5, %v405_v6, %v444_v7  ;;  %v433_v10 = vmul.f32 %v660_v50, %v431_v8 }
 0x27a   : > { %448 = vrot.lane.b32.xlu1 %v446_v9, %s675_s28 }
 0x27b   : > { %v486_v16 = vsel %vm457_vm6, %v433_v10, 0.0 }
 0x27c   : > { %v471_v11 = vpop.permute.xlu1 %470  ;;  %v459_v12 = vpop.permute.xlu0 %458 }
 0x27d   : > { %473 = vst.msk [vmem:[#allocation3] sm:$0x3] %vm451_vm7, %v471_v11  ;;  %v461_v14 = vsel %vm457_vm6, %v433_v10, %v459_v12 }
 0x27e   : > { %482 = vrot.lane.b32.xlu1 %v480_v13, %s675_s28  ;;  %463 = vrot.lane.b32.xlu0 %v461_v14, %s677_s10 }
 0x280   : > { %v477_v15 = vpop.permute.xlu0 %476 }
 0x281   : > { %479 = vst.msk [vmem:[#allocation4] sm:$0x3] %vm451_vm7, %v477_v15 }
 0x282   : > { %488 = vrot.lane.b32.xlu0 %v486_v16, %s675_s28 }
 0x2ec   : > { %v449_v17 = vpop.permute.xlu1 %448 }
 0x2ed   : > { %452 = vst.msk [vmem:[#allocation2] sm:$0x3] %vm451_vm7, %v449_v17 }
 0x2f0   : > { %v483_v18 = vpop.permute.xlu1 %482  ;;  %v464_v19 = vpop.permute.xlu0 %463 }
 0x2f1   : > { %485 = vst.msk [vmem:[%s739_s9] sm:$0x3] %vm451_vm7, %v483_v18 }
 0x2f2   : > { %467 = vst.msk [vmem:[#allocation2] sm:$0x3] %vm466_vm8, %v464_v19 }
 0x2f4   : > { %v489_v20 = vpop.permute.xlu0 %488 }
 0x2f5   : > { %491 = vst.msk [vmem:[%s744_s13] sm:$0x3] %vm451_vm7, %v489_v20 }
 0x2f6 PF: > { %s16_s18 = sadd.s32 1, %s671_s18  }
 0x2f7   : > { %p13_p6 = scmp.ge.s32.totalorder %s16_s18, 10  }
 0x2f9   :  { %15 = sbr.rel (!%p13_p6) target bundleno = 1 (0x1), region = 85 }

</bundles_post_ra>
